<compile_context>
chip_gen: v5e
topology: v5e:2x2
jax: 0.10.0
libtpu: 0.0.40
codegen_flags: <defaults>
</compile_context>

<pallas_src>
import jax
import jax.numpy as jnp
from jax.experimental import pallas as pl
from jax.experimental.pallas import tpu as pltpu


def _round_up(x: int, m: int) -> int:
    return ((x + m - 1) // m) * m


def _fused_mlp_kernel(x_ref, w1_ref, b1_ref, w2_ref, b2_ref, o_ref, h_acc):
    """Fused: out = relu(x @ W1 + b1) @ W2 + b2, K-tiled over the first matmul."""
    k = pl.program_id(1)

    @pl.when(k == 0)
    def _():
        h_acc[...] = jnp.zeros_like(h_acc)

    # First matmul partial product, accumulated in f32 on the MXU.
    h_acc[...] += jnp.dot(
        x_ref[...], w1_ref[...], preferred_element_type=jnp.float32
    )

    @pl.when(k == pl.num_programs(1) - 1)
    def _():
        # Epilogue on the f32 accumulator: bias add AFTER the full K reduction,
        # ReLU in f32 (v5e has no bf16 VALU), then the tiny second matmul + bias.
        h = jnp.maximum(h_acc[...] + b1_ref[...], 0.0)
        out = jnp.dot(h, w2_ref[...], preferred_element_type=jnp.float32)
        o_ref[...] = (out + b2_ref[...]).astype(o_ref.dtype)


def feedforward_nn(x, w1, b1, w2, b2, *, tb_max: int = 256, tk_max: int = 512):
    """Pallas forward pass of FeedforwardNN.

    Args:
      x:  [B, F] float32 input (feature-last, PyTorch nn.Linear convention).
      w1: [F, H] = fc1.weight.T ; b1: [H]
      w2: [H, O] = fc2.weight.T ; b2: [O]
    Returns:
      [B, O] float32 output.
    """
    B, F = x.shape
    H = w1.shape[1]
    O = w2.shape[1]

    # Batch tile: multiple of 8 sublanes, capped for VMEM friendliness.
    tb = min(tb_max, _round_up(B, 8))
    B_pad = _round_up(B, tb)

    # Lane-dense padding of all feature dimensions to multiples of 128.
    F_pad = _round_up(F, 128)
    tk = min(tk_max, F_pad)
    F_pad = _round_up(F_pad, tk)
    H_pad = _round_up(H, 128)
    O_pad = _round_up(O, 128)

    x_p = jnp.pad(x, ((0, B_pad - B), (0, F_pad - F)))
    w1_p = jnp.pad(w1, ((0, F_pad - F), (0, H_pad - H)))
    b1_p = jnp.pad(b1, ((0, H_pad - H),)).reshape(1, H_pad)
    w2_p = jnp.pad(w2, ((0, H_pad - H), (0, O_pad - O)))
    b2_p = jnp.pad(b2, ((0, O_pad - O),)).reshape(1, O_pad)

    grid = (B_pad // tb, F_pad // tk)

    out_padded = pl.pallas_call(
        _fused_mlp_kernel,
        out_shape=jax.ShapeDtypeStruct((B_pad, O_pad), x.dtype),
        grid_spec=pltpu.PrefetchScalarGridSpec(
            num_scalar_prefetch=0,
            grid=grid,
            in_specs=[
                pl.BlockSpec((tb, tk), lambda i, k: (i, k)),        # x tile
                pl.BlockSpec((tk, H_pad), lambda i, k: (k, 0)),     # W1 K-slab
                pl.BlockSpec((1, H_pad), lambda i, k: (0, 0)),      # b1 (resident)
                pl.BlockSpec((H_pad, O_pad), lambda i, k: (0, 0)),  # W2 (resident)
                pl.BlockSpec((1, O_pad), lambda i, k: (0, 0)),      # b2 (resident)
            ],
            out_specs=pl.BlockSpec((tb, O_pad), lambda i, k: (i, 0)),
            scratch_shapes=[pltpu.VMEM((tb, H_pad), jnp.float32)],  # hidden acc
        ),
        compiler_params=pltpu.CompilerParams(
            dimension_semantics=("parallel", "arbitrary"),
        ),
    )(x_p, w1_p, b1_p, w2_p, b2_p)

    return out_padded[:B, :O]


if __name__ == "__main__":
    # Small shapes consistent with the module: Boston housing -> 13 input
    # features, hidden_dim=64, output_dim=1. Batch = 8.
    batch, input_dim, hidden_dim, output_dim = 8, 13, 64, 1

    key = jax.random.PRNGKey(0)
    kx, kw1, kb1, kw2, kb2 = jax.random.split(key, 5)

    x = jax.random.normal(kx, (batch, input_dim), dtype=jnp.float32)
    # Weights stored pre-transposed as [in, out] (== torch fc.weight.T).
    w1 = jax.random.normal(kw1, (input_dim, hidden_dim), dtype=jnp.float32) / jnp.sqrt(input_dim)
    b1 = jax.random.normal(kb1, (hidden_dim,), dtype=jnp.float32) * 0.1
    w2 = jax.random.normal(kw2, (hidden_dim, output_dim), dtype=jnp.float32) / jnp.sqrt(hidden_dim)
    b2 = jax.random.normal(kb2, (output_dim,), dtype=jnp.float32) * 0.1

    out = feedforward_nn(x, w1, b1, w2, b2)
    out = jax.block_until_ready(out)

    # Pure-JAX f32 reference.
    ref = jnp.maximum(x @ w1 + b1, 0.0) @ w2 + b2
    assert out.shape == (batch, output_dim), out.shape
    assert jnp.allclose(out, ref, rtol=1e-3, atol=1e-3), (out, ref)

    print("KERNEL_OK")
</pallas_src>

<mosaic_0001>
module attributes {stable_mosaic.version = 11 : i64} {
  func.func @_fused_mlp_kernel(%arg0: i32, %arg1: i32, %arg2: memref<8x128xf32, #tpu.memory_space<vmem>>, %arg3: memref<128x128xf32, #tpu.memory_space<vmem>>, %arg4: memref<1x128xf32, #tpu.memory_space<vmem>>, %arg5: memref<128x128xf32, #tpu.memory_space<vmem>>, %arg6: memref<1x128xf32, #tpu.memory_space<vmem>>, %arg7: memref<8x128xf32, #tpu.memory_space<vmem>>, %arg8: memref<8x128xf32, #tpu.memory_space<vmem>>) attributes {dimension_semantics = [#tpu.dimension_semantics<parallel>, #tpu.dimension_semantics<arbitrary>], iteration_bounds = array<i64: 1, 1>, scalar_prefetch = 0 : i64, scratch_operands = 1 : i64, tpu.core_type = #tpu.core_type<tc>, window_params = [{transform_indices = @transform_0, window_bounds = array<i64: 8, 128>}, {transform_indices = @transform_1, window_bounds = array<i64: 128, 128>}, {pipeline_mode = #tpu.pipeline_mode<synchronous>, transform_indices = @transform_2, window_bounds = array<i64: 1, 128>}, {pipeline_mode = #tpu.pipeline_mode<synchronous>, transform_indices = @transform_3, window_bounds = array<i64: 128, 128>}, {pipeline_mode = #tpu.pipeline_mode<synchronous>, transform_indices = @transform_4, window_bounds = array<i64: 1, 128>}, {transform_indices = @transform_5, window_bounds = array<i64: 8, 128>}]} {
    %c0_i32 = arith.constant 0 : i32
    %0 = arith.cmpi eq, %arg1, %c0_i32 : i32
    %1 = arith.extui %0 : i1 to i32
    %c0_i32_0 = arith.constant 0 : i32
    %2 = arith.cmpi ne, %1, %c0_i32_0 : i32
    scf.if %2 {
      %cst_10 = arith.constant 0.000000e+00 : f32
      %12 = vector.broadcast %cst_10 : f32 to vector<8x128xf32>
      %c0_11 = arith.constant 0 : index
      %c0_12 = arith.constant 0 : index
      %13 = vector.load %arg8[%c0_11, %c0_12] : memref<8x128xf32, #tpu.memory_space<vmem>>, vector<8x128xf32>
      tpu.vector_store %arg8[%c0_11, %c0_12], %12 {strides = array<i32>} : memref<8x128xf32, #tpu.memory_space<vmem>>, vector<8x128xf32>,
    } else {
    }
    %c0 = arith.constant 0 : index
    %c0_1 = arith.constant 0 : index
    %3 = vector.load %arg8[%c0, %c0_1] : memref<8x128xf32, #tpu.memory_space<vmem>>, vector<8x128xf32>
    %c0_2 = arith.constant 0 : index
    %c0_3 = arith.constant 0 : index
    %4 = vector.load %arg2[%c0_2, %c0_3] : memref<8x128xf32, #tpu.memory_space<vmem>>, vector<8x128xf32>
    %c0_4 = arith.constant 0 : index
    %c0_5 = arith.constant 0 : index
    %5 = vector.load %arg3[%c0_4, %c0_5] : memref<128x128xf32, #tpu.memory_space<vmem>>, vector<128x128xf32>
    %cst = arith.constant dense<0.000000e+00> : vector<8x128xf32>
    %6 = tpu.matmul %4, %5, %cst {dimension_numbers = #tpu.dot_dimension_numbers<[1], [0], [0], [1], [0, 0, 1, 1], [], []>} : vector<8x128xf32>, vector<128x128xf32>, vector<8x128xf32> -> vector<8x128xf32>
    %7 = arith.addf %3, %6 : vector<8x128xf32>
    %c0_6 = arith.constant 0 : index
    %c0_7 = arith.constant 0 : index
    %8 = vector.load %arg8[%c0_6, %c0_7] : memref<8x128xf32, #tpu.memory_space<vmem>>, vector<8x128xf32>
    tpu.vector_store %arg8[%c0_6, %c0_7], %7 {strides = array<i32>} : memref<8x128xf32, #tpu.memory_space<vmem>>, vector<8x128xf32>,
    %c0_i32_8 = arith.constant 0 : i32
    %9 = arith.cmpi eq, %arg1, %c0_i32_8 : i32
    %10 = arith.extui %9 : i1 to i32
    %c0_i32_9 = arith.constant 0 : i32
    %11 = arith.cmpi ne, %10, %c0_i32_9 : i32
    scf.if %11 {
      %c0_10 = arith.constant 0 : index
      %c0_11 = arith.constant 0 : index
      %12 = vector.load %arg8[%c0_10, %c0_11] : memref<8x128xf32, #tpu.memory_space<vmem>>, vector<8x128xf32>
      %c0_12 = arith.constant 0 : index
      %c0_13 = arith.constant 0 : index
      %13 = vector.load %arg4[%c0_12, %c0_13] : memref<1x128xf32, #tpu.memory_space<vmem>>, vector<1x128xf32>
      %14 = vector.broadcast %13 : vector<1x128xf32> to vector<8x128xf32>
      %15 = arith.addf %12, %14 : vector<8x128xf32>
      %cst_14 = arith.constant 0.000000e+00 : f32
      %16 = vector.broadcast %cst_14 : f32 to vector<8x128xf32>
      %17 = arith.maximumf %15, %16 : vector<8x128xf32>
      %c0_15 = arith.constant 0 : index
      %c0_16 = arith.constant 0 : index
      %18 = vector.load %arg5[%c0_15, %c0_16] : memref<128x128xf32, #tpu.memory_space<vmem>>, vector<128x128xf32>
      %cst_17 = arith.constant dense<0.000000e+00> : vector<8x128xf32>
      %19 = tpu.matmul %17, %18, %cst_17 {dimension_numbers = #tpu.dot_dimension_numbers<[1], [0], [0], [1], [0, 0, 1, 1], [], []>} : vector<8x128xf32>, vector<128x128xf32>, vector<8x128xf32> -> vector<8x128xf32>
      %c0_18 = arith.constant 0 : index
      %c0_19 = arith.constant 0 : index
      %20 = vector.load %arg6[%c0_18, %c0_19] : memref<1x128xf32, #tpu.memory_space<vmem>>, vector<1x128xf32>
      %21 = vector.broadcast %20 : vector<1x128xf32> to vector<8x128xf32>
      %22 = arith.addf %19, %21 : vector<8x128xf32>
      %c0_20 = arith.constant 0 : index
      %c0_21 = arith.constant 0 : index
      %23 = vector.load %arg7[%c0_20, %c0_21] : memref<8x128xf32, #tpu.memory_space<vmem>>, vector<8x128xf32>
      tpu.vector_store %arg7[%c0_20, %c0_21], %22 {strides = array<i32>} : memref<8x128xf32, #tpu.memory_space<vmem>>, vector<8x128xf32>,
    } else {
    }
    return
  }
  func.func @transform_0(%arg0: i32, %arg1: i32) -> (i32, i32) {
    %c0_i32 = arith.constant 0 : i32
    return %arg0, %arg1 : i32, i32
  }
  func.func @transform_1(%arg0: i32, %arg1: i32) -> (i32, i32) {
    %c0_i32 = arith.constant 0 : i32
    %c0_i32_0 = arith.constant 0 : i32
    return %arg1, %c0_i32 : i32, i32
  }
  func.func @transform_2(%arg0: i32, %arg1: i32) -> (i32, i32) {
    %c0_i32 = arith.constant 0 : i32
    %c0_i32_0 = arith.constant 0 : i32
    %c0_i32_1 = arith.constant 0 : i32
    return %c0_i32, %c0_i32_0 : i32, i32
  }
  func.func @transform_3(%arg0: i32, %arg1: i32) -> (i32, i32) {
    %c0_i32 = arith.constant 0 : i32
    %c0_i32_0 = arith.constant 0 : i32
    %c0_i32_1 = arith.constant 0 : i32
    return %c0_i32, %c0_i32_0 : i32, i32
  }
  func.func @transform_4(%arg0: i32, %arg1: i32) -> (i32, i32) {
    %c0_i32 = arith.constant 0 : i32
    %c0_i32_0 = arith.constant 0 : i32
    %c0_i32_1 = arith.constant 0 : i32
    return %c0_i32, %c0_i32_0 : i32, i32
  }
  func.func @transform_5(%arg0: i32, %arg1: i32) -> (i32, i32) {
    %c0_i32 = arith.constant 0 : i32
    %c0_i32_0 = arith.constant 0 : i32
    return %arg0, %c0_i32 : i32, i32
  }
}

</mosaic_0001>

<bundles_post_ra>
// kernel: tpu_custom_call.1
= control target key start
LH: loop header
LB: loop body
LE: loop exit
PB: predicated region body
PF: predicated region fallthrough
CT: control target
= control target key end

     0   :  { %10 = vsyncpa [#allocation4], 0  ;;  %s344_s0 = inlined_call_operand.hbm [shape: f32[8,128], index: 0, kind: input, shape index: {}]   ;;  %s345_s1 = inlined_call_operand.hbm [shape: f32[128,128], index: 1, kind: input, shape index: {}]   ;;  %s346_s2 = inlined_call_operand.vmem [shape: f32[1,128], index: 2, kind: input, shape index: {}]   ;;  %s347_s3 = inlined_call_operand.hbm [shape: f32[128,128], index: 3, kind: input, shape index: {}]   ;;  %s348_s4 = inlined_call_operand.vmem [shape: f32[1,128], index: 4, kind: input, shape index: {}]   ;;  %s349_s5 = inlined_call_operand.hbm [shape: f32[8,128], index: 5, kind: output, shape index: {}]  }
   0x1   :  { %11 = vsyncpa [#allocation7], 0  ;;  %s28_s20 = sshll.u32 %s345_s1, 4  ;;  %s29_s20 = int_to_ptr.hbm [resolvable:$true] %s28_s20 }
   0x2   :  { %12 = vsyncpa [#allocation5], 0  ;;  %s290_s21 = smov [#allocation6]   ;;  %s18_s25 = sshll.u32 %s344_s0, 4  ;;  %s19_s25 = int_to_ptr.hbm [resolvable:$true] %s18_s25 }
   0x3   :  { %s30_s22 = sshll.u32 %s290_s21, 4  ;;  %s291_s26 = smov 128   ;;  %s31_s22 = int_to_ptr.vmem [resolvable:$true] %s30_s22 }
   0x4   :  { %s292_s27 = smov 8   ;;  %s293_s28 = smov [#allocation3]  }
   0x5   :  { %36 = dma.hbm_to_vmem [thread:$0]  %s29_s20, 2048, %s31_s22, [#allocation7], %s291_s26, %s291_s26, %s292_s27  }
   0x6   :  { %s20_s29 = sshll.u32 %s293_s28, 4  ;;  %s43_s7 = sshll.u32 %s347_s3, 4  ;;  %s21_s29 = int_to_ptr.vmem [resolvable:$true] %s20_s29  ;;  %s44_s7 = int_to_ptr.hbm [resolvable:$true] %s43_s7 }
   0x7   :  { %23 = dma.hbm_to_vmem [thread:$0]  %s19_s25, 128, %s21_s29, [#allocation4]  }
   0x8   :  { %s294_s1 = smov [#allocation8]  }
   0x9   :  { %s45_s8 = sshll.u32 %s294_s1, 4  ;;  %s46_s8 = int_to_ptr.vmem [resolvable:$true] %s45_s8 }
   0xa   :  { %51 = dma.hbm_to_vmem [thread:$0]  %s44_s7, 2048, %s46_s8, [#allocation7], %s291_s26, %s291_s26, %s292_s27  }
   0xb   :  { %284 = dma.done.wait [#allocation4], 128  }
   0xc   :  { %285 = vsyncadd [#allocation4], 4294967168 }
   0xd   :  { %286 = dma.done.wait [#allocation7], 4096  }
   0xe   :  { %287 = vsyncadd [#allocation7], 4294963200  ;;  %v88_v0 = vld [vmem:[#allocation6 + $0x78] sm:$0xff]  ;;  %v87_v1 = vld [vmem:[#allocation6 + $0x70] sm:$0xff]  ;;  %s295_s11 = smov [#allocation9]   ;;  %s169_s15 = sshll.u32 %s349_s5, 4  ;;  %s170_s15 = int_to_ptr.hbm [resolvable:$true] %s169_s15 }
   0xf   :  { %89 = vmatpush.msra.mxu0 %v88_v0  ;;  %v86_v2 = vld [vmem:[#allocation6 + $0x68] sm:$0xff]  ;;  %v85_v3 = vld [vmem:[#allocation6 + $0x60] sm:$0xff]  ;;  %v136_v4 = vld [vmem:[#allocation8 + $0x78] sm:$0xff]  ;;  %s167_s12 = sshll.u32 %s295_s11, 4  ;;  %s168_s12 = int_to_ptr.vmem [resolvable:$true] %s167_s12 }
  0x10   :  { %v84_v5 = vld [vmem:[#allocation6 + $0x58] sm:$0xff]  ;;  %141 = vmatpush.msra.mxu1 %v136_v4  ;;  %v135_v6 = vld [vmem:[#allocation8 + $0x70] sm:$0xff]  ;;  %v134_v7 = vld [vmem:[#allocation8 + $0x68] sm:$0xff] }
  0x11   :  { %90 = vmatpush.msra.mxu0 %v87_v1  ;;  %v83_v8 = vld [vmem:[#allocation6 + $0x50] sm:$0xff]  ;;  %v133_v9 = vld [vmem:[#allocation8 + $0x60] sm:$0xff]  ;;  %v82_v10 = vld [vmem:[#allocation6 + $0x48] sm:$0xff] }
  0x12   :  { %142 = vmatpush.msra.mxu1 %v135_v6  ;;  %v132_v11 = vld [vmem:[#allocation8 + $0x58] sm:$0xff]  ;;  %v81_v12 = vld [vmem:[#allocation6 + $0x40] sm:$0xff]  ;;  %v131_v13 = vld [vmem:[#allocation8 + $0x50] sm:$0xff] }
  0x13   :  { %91 = vmatpush.msra.mxu0 %v86_v2  ;;  %v80_v14 = vld [vmem:[#allocation6 + $0x38] sm:$0xff]  ;;  %v130_v15 = vld [vmem:[#allocation8 + $0x48] sm:$0xff]  ;;  %v79_v16 = vld [vmem:[#allocation6 + $0x30] sm:$0xff] }
  0x14   :  { %143 = vmatpush.msra.mxu1 %v134_v7  ;;  %v129_v17 = vld [vmem:[#allocation8 + $0x40] sm:$0xff]  ;;  %v78_v18 = vld [vmem:[#allocation6 + $0x28] sm:$0xff]  ;;  %v128_v19 = vld [vmem:[#allocation8 + $0x38] sm:$0xff] }
  0x15   :  { %92 = vmatpush.msra.mxu0 %v85_v3  ;;  %v77_v20 = vld [vmem:[#allocation6 + $0x20] sm:$0xff]  ;;  %v127_v21 = vld [vmem:[#allocation8 + $0x30] sm:$0xff]  ;;  %v76_v22 = vld [vmem:[#allocation6 + $0x18] sm:$0xff] }
  0x16   :  { %144 = vmatpush.msra.mxu1 %v133_v9  ;;  %v126_v23 = vld [vmem:[#allocation8 + $0x28] sm:$0xff]  ;;  %v75_v24 = vld [vmem:[#allocation6 + $0x10] sm:$0xff]  ;;  %v125_v25 = vld [vmem:[#allocation8 + $0x20] sm:$0xff] }
  0x17   :  { %93 = vmatpush.msra.mxu0 %v84_v5  ;;  %v74_v26 = vld [vmem:[#allocation6 + $0x8] sm:$0xff]  ;;  %v124_v27 = vld [vmem:[#allocation8 + $0x18] sm:$0xff]  ;;  %v73_v28 = vld [vmem:[#allocation6] sm:$0xff] }
  0x18   :  { %145 = vmatpush.msra.mxu1 %v132_v11  ;;  %v72_v29 = vld [vmem:[#allocation3] sm:$0xff]  ;;  %v123_v30 = vld [vmem:[#allocation8 + $0x10] sm:$0xff]  ;;  %v122_v31 = vld [vmem:[#allocation8 + $0x8] sm:$0xff] }
  0x19   :  { %94 = vmatpush.msra.mxu0 %v83_v8  ;;  %v121_v32 = vld [vmem:[#allocation8] sm:$0xff]  ;;  %v186_v33 = vld [vmem:[%s346_s2] ss:$0 sm:$0xff] }
  0x1a   :  { %146 = vmatpush.msra.mxu1 %v131_v13  ;;  %v187_v37 = vld [vmem:[%s348_s4] ss:$0 sm:$0xff] }
  0x1b   :  { %95 = vmatpush.msra.mxu0 %v82_v10 }
  0x1c   :  { %147 = vmatpush.msra.mxu1 %v130_v15 }
  0x1d   :  { %96 = vmatpush.msra.mxu0 %v81_v12 }
  0x1e   :  { %148 = vmatpush.msra.mxu1 %v129_v17 }
  0x1f   :  { %97 = vmatpush.msra.mxu0 %v80_v14 }
  0x20   :  { %149 = vmatpush.msra.mxu1 %v128_v19 }
  0x21   :  { %98 = vmatpush.msra.mxu0 %v79_v16 }
  0x22   :  { %150 = vmatpush.msra.mxu1 %v127_v21 }
  0x23   :  { %99 = vmatpush.msra.mxu0 %v78_v18 }
  0x24   :  { %151 = vmatpush.msra.mxu1 %v126_v23 }
  0x25   :  { %100 = vmatpush.msra.mxu0 %v77_v20 }
  0x26   :  { %152 = vmatpush.msra.mxu1 %v125_v25 }
  0x27   :  { %101 = vmatpush.msra.mxu0 %v76_v22 }
  0x28   :  { %153 = vmatpush.msra.mxu1 %v124_v27 }
  0x29   :  { %102 = vmatpush.msra.mxu0 %v75_v24 }
  0x2a   :  { %154 = vmatpush.msra.mxu1 %v123_v30 }
  0x2b   :  { %103 = vmatpush.msra.mxu0 %v74_v26 }
  0x2c   :  { %155 = vmatpush.msra.mxu1 %v122_v31 }
  0x2d   :  { %104 = vmatpush.msra.mxu0 %v73_v28 }
  0x2e   :  { %105 = vmatmul.f32.vlgmr.msra.gmra.mxu0 %v72_v29  ;;  %156 = vmatpush.msra.mxu1 %v121_v32 }
  0xab   :  { %v106_v34 = vpop.f32.mrf.mxu0 }
  0xac   :  { %v119_v35 = vadd.f32 %v186_v33, %v106_v34 }
  0xae   :  { %v120_v36 = vmax.f32 %v119_v35, 0.0 }
  0xb0   :  { %157 = vmatmul.f32.vlgmr.msra.gmra.mxu1 %v120_v36 }
 0x12d   :  { %v158_v38 = vpop.f32.mrf.mxu1 }
 0x12e   :  { %v159_v39 = vadd.f32 %v187_v37, %v158_v38 }
 0x130   :  { %161 = vst [vmem:[#allocation9] sm:$0xff] %v159_v39 }
 0x131   :  { %172 = dma.vmem_to_hbm [thread:$0]  %s168_s12, 128, %s170_s15, [#allocation5]  }
 0x132   :  { %288 = dma.done.wait [#allocation5], 128  }
 0x133   :  { %289 = vsyncadd [#allocation5], 4294967168 }
 0x134   :  { %177 = vsyncpa [#allocation4], 1 }
 0x135   :  { %178 = vsyncpa [#allocation7], 1 }
 0x136   :  { %179 = vsyncpa [#allocation5], 1 }

</bundles_post_ra>
